<compile_context>
chip_gen: v6e
topology: v6e:2x2x1
jax: 0.10.0
libtpu: 0.0.40
codegen_flags: <defaults>
</compile_context>

<pallas_src>
import functools

import jax
import jax.numpy as jnp
from jax.experimental import pallas as pl
from jax.experimental.pallas import tpu as pltpu

EPS = 1e-6
_F32 = jnp.float32
_VMEM_LIMIT = 48 * 1024 * 1024  # < v7x 64 MiB physical, > all default scoped caps


def _elu_p1(x):
    # elu(x, alpha=1) + 1  (default fast_transformers feature map)
    return jnp.where(x > 0, x + 1.0, jnp.exp(x))


def _pick_batch_block(n, bytes_per_row, target_bytes=2 << 20):
    """Choose the per-grid-step batch block.

    Sized so the Si block is a few MiB (per-step overhead amortized, stays
    inside every generation's default/raised scoped-VMEM budget with double
    buffering), and capped so the grid has >= 2 steps when N >= 2 so the
    'parallel' batch axis can use both TensorCores on v7x.
    """
    nb = max(1, min(n, target_bytes // max(1, bytes_per_row)))
    if n >= 2 and nb >= n:
        nb = (n + 1) // 2
    return nb


# ---------------------------------------------------------------------------
# Single-token recurrent step kernel (API-faithful to the PyTorch forward).
# ---------------------------------------------------------------------------

def _step_kernel(q_ref, k_ref, v_ref, zi_ref, si_ref,
                 v_out_ref, zi_out_ref, si_out_ref, kf_out_ref, *, eps):
    # Blocks: q/k/zi (NB,H,D), v (NB,H,M), si (NB,H,D,M).
    Q = _elu_p1(q_ref[...].astype(_F32))                      # (NB,H,D)
    Kn = _elu_p1(k_ref[...].astype(_F32))                     # (NB,H,D)
    Vn = v_ref[...].astype(_F32)                              # (NB,H,M)

    # O(1) state update (replaces any O(J) history recompute).
    Zi = zi_ref[...] + Kn                                     # (NB,H,D)
    Si = si_ref[...] + Kn[..., :, None] * Vn[..., None, :]    # VPU rank-1

    # Normalizer and output, all on the VPU (no tiny MXU dots).
    denom = jnp.sum(Q * Zi, axis=-1, keepdims=True) + eps     # (NB,H,1)
    V = jnp.sum(Q[..., :, None] * Si, axis=-2) / denom        # (NB,H,M)

    v_out_ref[...] = V.astype(v_out_ref.dtype)
    zi_out_ref[...] = Zi
    si_out_ref[...] = Si
    kf_out_ref[...] = Kn.astype(kf_out_ref.dtype)


def _step_pallas(query, key, value, zi, si, eps):
    N, H, D = query.shape
    M = value.shape[-1]
    NB = _pick_batch_block(N, H * D * M * 4)
    grid = (pl.cdiv(N, NB),)

    kernel = functools.partial(_step_kernel, eps=eps)
    out_shape = (
        jax.ShapeDtypeStruct((N, H, M), query.dtype),     # V
        jax.ShapeDtypeStruct((N, H, D), _F32),            # Zi (new)
        jax.ShapeDtypeStruct((N, H, D, M), _F32),         # Si (new)
        jax.ShapeDtypeStruct((N, H, D), _F32),            # Kn = elu(k)+1
    )
    in_specs = [
        pl.BlockSpec((NB, H, D), lambda i: (i, 0, 0)),
        pl.BlockSpec((NB, H, D), lambda i: (i, 0, 0)),
        pl.BlockSpec((NB, H, M), lambda i: (i, 0, 0)),
        pl.BlockSpec((NB, H, D), lambda i: (i, 0, 0)),
        pl.BlockSpec((NB, H, D, M), lambda i: (i, 0, 0, 0)),
    ]
    out_specs = (
        pl.BlockSpec((NB, H, M), lambda i: (i, 0, 0)),
        pl.BlockSpec((NB, H, D), lambda i: (i, 0, 0)),
        pl.BlockSpec((NB, H, D, M), lambda i: (i, 0, 0, 0)),
        pl.BlockSpec((NB, H, D), lambda i: (i, 0, 0)),
    )
    return pl.pallas_call(
        kernel,
        out_shape=out_shape,
        grid=grid,
        in_specs=in_specs,
        out_specs=out_specs,
        # In-place recurrent state: zi -> zi_out, si -> si_out.
        input_output_aliases={3: 1, 4: 2},
        compiler_params=pltpu.CompilerParams(
            dimension_semantics=("parallel",),
            vmem_limit_bytes=_VMEM_LIMIT),
    )(query, key, value, zi, si)


# ---------------------------------------------------------------------------
# Multi-token sequence kernel: Zi/Si stay VMEM-resident across the time axis.
# ---------------------------------------------------------------------------

def _seq_kernel(q_ref, k_ref, v_ref, zi0_ref, si0_ref,
                v_out_ref, zi_out_ref, si_out_ref, kf_out_ref,
                zi_acc, si_acc, *, eps):
    t = pl.program_id(1)

    @pl.when(t == 0)
    def _init():
        zi_acc[...] = zi0_ref[...]
        si_acc[...] = si0_ref[...]

    Q = _elu_p1(q_ref[0].astype(_F32))                        # (NB,H,D)
    Kn = _elu_p1(k_ref[0].astype(_F32))                       # (NB,H,D)
    Vn = v_ref[0].astype(_F32)                                # (NB,H,M)

    Zi = zi_acc[...] + Kn
    Si = si_acc[...] + Kn[..., :, None] * Vn[..., None, :]
    zi_acc[...] = Zi
    si_acc[...] = Si

    denom = jnp.sum(Q * Zi, axis=-1, keepdims=True) + eps
    V = jnp.sum(Q[..., :, None] * Si, axis=-2) / denom

    v_out_ref[0] = V.astype(v_out_ref.dtype)
    kf_out_ref[0] = Kn.astype(kf_out_ref.dtype)

    @pl.when(t == pl.num_programs(1) - 1)
    def _finalize():
        zi_out_ref[...] = Zi
        si_out_ref[...] = Si


def _sequence_pallas(q_seq, k_seq, v_seq, zi, si, eps):
    T, N, H, D = q_seq.shape
    M = v_seq.shape[-1]
    NB = _pick_batch_block(N, H * D * M * 4, target_bytes=4 << 20)
    grid = (pl.cdiv(N, NB), T)

    kernel = functools.partial(_seq_kernel, eps=eps)
    out_shape = (
        jax.ShapeDtypeStruct((T, N, H, M), q_seq.dtype),  # V per token
        jax.ShapeDtypeStruct((N, H, D), _F32),            # final Zi
        jax.ShapeDtypeStruct((N, H, D, M), _F32),         # final Si
        jax.ShapeDtypeStruct((T, N, H, D), _F32),         # Kn per token
    )
    in_specs = [
        pl.BlockSpec((1, NB, H, D), lambda b, t: (t, b, 0, 0)),
        pl.BlockSpec((1, NB, H, D), lambda b, t: (t, b, 0, 0)),
        pl.BlockSpec((1, NB, H, M), lambda b, t: (t, b, 0, 0)),
        pl.BlockSpec((NB, H, D), lambda b, t: (b, 0, 0)),
        pl.BlockSpec((NB, H, D, M), lambda b, t: (b, 0, 0, 0)),
    ]
    out_specs = (
        pl.BlockSpec((1, NB, H, M), lambda b, t: (t, b, 0, 0)),
        pl.BlockSpec((NB, H, D), lambda b, t: (b, 0, 0)),
        pl.BlockSpec((NB, H, D, M), lambda b, t: (b, 0, 0, 0)),
        pl.BlockSpec((1, NB, H, D), lambda b, t: (t, b, 0, 0)),
    )
    return pl.pallas_call(
        kernel,
        out_shape=out_shape,
        grid=grid,
        in_specs=in_specs,
        out_specs=out_specs,
        scratch_shapes=[pltpu.VMEM((NB, H, D), _F32),
                        pltpu.VMEM((NB, H, D, M), _F32)],
        input_output_aliases={3: 1, 4: 2},
        compiler_params=pltpu.CompilerParams(
            dimension_semantics=("parallel", "arbitrary"),
            vmem_limit_bytes=_VMEM_LIMIT),
    )(q_seq, k_seq, v_seq, zi, si)


# ---------------------------------------------------------------------------
# Python-level wrappers (state handling, O(tokens) history append).
# ---------------------------------------------------------------------------

def _init_state(N, H, D, M, capacity):
    cap = max(1, capacity)
    return (jnp.zeros((cap, N, H, D), _F32),       # K history, time-major
            jnp.zeros((cap, N, H, M), _F32),       # V history, time-major
            0,                                     # valid length
            jnp.zeros((N, H, D), _F32),            # Zi accumulator
            jnp.zeros((N, H, D, M), _F32))         # Si accumulator


def _append_history(kh, vh, length, kf_block, v_block):
    """O(tokens) append: dynamic_update_slice into preallocated time-major
    buffers (contiguous slab write) instead of an O(J) concatenate per step."""
    t = kf_block.shape[0]
    while kh.shape[0] < length + t:                # rare capacity doubling
        kh = jnp.concatenate([kh, jnp.zeros_like(kh)], axis=0)
        vh = jnp.concatenate([vh, jnp.zeros_like(vh)], axis=0)
    kh = jax.lax.dynamic_update_slice(kh, kf_block, (length, 0, 0, 0))
    vh = jax.lax.dynamic_update_slice(vh, v_block, (length, 0, 0, 0))
    return kh, vh, length + t


def history(state):
    """Recover the PyTorch-layout state: (K (N,H,D,J), value (N,H,M,J))."""
    kh, vh, length, _, _ = state
    return jnp.moveaxis(kh[:length], 0, -1), jnp.moveaxis(vh[:length], 0, -1)


def recurrent_linear_attention_pplm(query, key, value, state=None,
                                    eps=EPS, history_capacity=64):
    """One recurrent step; matches RecurrentLinearAttentionPPLM.forward.

    Returns (V, state) with state = (K_hist_tm, V_hist_tm, length, Zi, Si).
    Zi/Si make the per-step cost independent of the history length; the
    history is only kept for API compatibility (use `history(state)` to get
    the PyTorch (N,H,D,J)/(N,H,M,J) layout).
    """
    N, H, D = query.shape
    M = value.shape[-1]
    if state is None:
        state = _init_state(N, H, D, M, history_capacity)
    kh, vh, length, zi, si = state

    V, zi_new, si_new, kf = _step_pallas(query, key, value, zi, si, eps)
    kh, vh, length = _append_history(kh, vh, length,
                                     kf[None], value[None].astype(_F32))
    return V, (kh, vh, length, zi_new, si_new)


def linear_attention_pplm_sequence(q_seq, k_seq, v_seq, state=None,
                                   eps=EPS, history_capacity=64):
    """Process T tokens in one pallas_call (Zi/Si VMEM-resident).

    Equivalent to T successive calls of recurrent_linear_attention_pplm; this
    is the review's "biggest structural win" variant.
    """
    T, N, H, D = q_seq.shape
    M = v_seq.shape[-1]
    if state is None:
        state = _init_state(N, H, D, M, max(T, history_capacity))
    kh, vh, length, zi, si = state

    V_seq, zi_new, si_new, kf_seq = _sequence_pallas(q_seq, k_seq, v_seq,
                                                     zi, si, eps)
    kh, vh, length = _append_history(kh, vh, length,
                                     kf_seq, v_seq.astype(_F32))
    return V_seq, (kh, vh, length, zi_new, si_new)


# ---------------------------------------------------------------------------
# Pure-JAX reference (VPU ops only, so it is exact f32 on TPU).
# ---------------------------------------------------------------------------

def _reference_step(query, key, value, state=None, eps=EPS):
    Q = _elu_p1(query.astype(_F32))
    K = _elu_p1(key.astype(_F32))
    value = value.astype(_F32)
    if state is None:
        Kh, Vh = K[..., None], value[..., None]
    else:
        Kh = jnp.concatenate([state[0], K[..., None]], axis=-1)
        Vh = jnp.concatenate([state[1], value[..., None]], axis=-1)
    Zi = jnp.sum(Kh, axis=-1)                                          # (N,H,D)
    Si = jnp.sum(Kh[..., :, None, :] * Vh[..., None, :, :], axis=-1)   # (N,H,D,M)
    denom = jnp.sum(Q * Zi, axis=-1, keepdims=True) + eps              # (N,H,1)
    V = jnp.sum(Q[..., :, None] * Si, axis=-2) / denom                 # (N,H,M)
    return V, (Kh, Vh)


if __name__ == "__main__":
    N, H, D, M = 2, 4, 32, 32     # batch, heads, query_dimensions, value dim
    STEPS = 8

    root = jax.random.PRNGKey(0)
    keys = jax.random.split(root, 3 * STEPS)
    qs = [jax.random.normal(keys[3 * i + 0], (N, H, D), jnp.float32) for i in range(STEPS)]
    ks = [jax.random.normal(keys[3 * i + 1], (N, H, D), jnp.float32) for i in range(STEPS)]
    vs = [jax.random.normal(keys[3 * i + 2], (N, H, M), jnp.float32) for i in range(STEPS)]

    def close(a, b, rtol=1e-4, atol=1e-5):
        return bool(jnp.allclose(a, b, rtol=rtol, atol=atol))

    ok = True

    # --- recurrent single-step API (one token per pallas_call) -------------
    state, ref_state = None, None
    ref_vs = []
    for i in range(STEPS):
        V, state = recurrent_linear_attention_pplm(qs[i], ks[i], vs[i], state)
        jax.block_until_ready(V)
        jax.block_until_ready(state[4])

        V_ref, ref_state = _reference_step(qs[i], ks[i], vs[i], ref_state)
        ref_vs.append(V_ref)

        Kh, Vh = history(state)
        ok &= close(V, V_ref)
        ok &= close(Kh, ref_state[0])
        ok &= close(Vh, ref_state[1])

    # --- multi-token sequence kernel (Si VMEM-resident across T) -----------
    q_seq, k_seq, v_seq = jnp.stack(qs), jnp.stack(ks), jnp.stack(vs)
    V_seq, seq_state = linear_attention_pplm_sequence(q_seq, k_seq, v_seq)
    jax.block_until_ready(V_seq)
    jax.block_until_ready(seq_state[4])

    for i in range(STEPS):
        ok &= close(V_seq[i], ref_vs[i])
    Kh_s, Vh_s = history(seq_state)
    ok &= close(Kh_s, ref_state[0])
    ok &= close(Vh_s, ref_state[1])
    ok &= close(seq_state[3], state[3])   # final Zi agrees with step-by-step
    ok &= close(seq_state[4], state[4])   # final Si agrees with step-by-step

    if ok:
        print("KERNEL_OK")
    else:
        raise SystemExit("mismatch vs reference")
</pallas_src>

<mosaic_0001>
module attributes {stable_mosaic.version = 11 : i64} {
  func.func @_step_kernel(%arg0: i32, %arg1: memref<1x4x32xf32, #tpu.memory_space<vmem>>, %arg2: memref<1x4x32xf32, #tpu.memory_space<vmem>>, %arg3: memref<1x4x32xf32, #tpu.memory_space<vmem>>, %arg4: memref<1x4x32xf32, #tpu.memory_space<vmem>>, %arg5: memref<1x4x32x32xf32, #tpu.memory_space<vmem>>, %arg6: memref<1x4x32xf32, #tpu.memory_space<vmem>>, %arg7: memref<1x4x32xf32, #tpu.memory_space<vmem>>, %arg8: memref<1x4x32x32xf32, #tpu.memory_space<vmem>>, %arg9: memref<1x4x32xf32, #tpu.memory_space<vmem>>) attributes {dimension_semantics = [#tpu.dimension_semantics<parallel>], iteration_bounds = array<i64: 2>, scalar_prefetch = 0 : i64, scratch_operands = 0 : i64, tpu.core_type = #tpu.core_type<tc>, window_params = [{transform_indices = @transform_0, window_bounds = array<i64: 1, 4, 32>}, {transform_indices = @transform_1, window_bounds = array<i64: 1, 4, 32>}, {transform_indices = @transform_2, window_bounds = array<i64: 1, 4, 32>}, {transform_indices = @transform_3, window_bounds = array<i64: 1, 4, 32>}, {transform_indices = @transform_4, window_bounds = array<i64: 1, 4, 32, 32>}, {transform_indices = @transform_5, window_bounds = array<i64: 1, 4, 32>}, {transform_indices = @transform_6, window_bounds = array<i64: 1, 4, 32>}, {transform_indices = @transform_7, window_bounds = array<i64: 1, 4, 32, 32>}, {transform_indices = @transform_8, window_bounds = array<i64: 1, 4, 32>}]} {
    %c0 = arith.constant 0 : index
    %c0_0 = arith.constant 0 : index
    %c0_1 = arith.constant 0 : index
    %0 = vector.load %arg1[%c0, %c0_0, %c0_1] : memref<1x4x32xf32, #tpu.memory_space<vmem>>, vector<1x4x32xf32>
    %cst = arith.constant 0.000000e+00 : f32
    %1 = vector.broadcast %cst : f32 to vector<1x4x32xf32>
    %2 = arith.cmpf ogt, %0, %1 : vector<1x4x32xf32>
    %cst_2 = arith.constant 1.000000e+00 : f32
    %3 = vector.broadcast %cst_2 : f32 to vector<1x4x32xf32>
    %4 = arith.addf %0, %3 : vector<1x4x32xf32>
    %5 = math.exp %0 : vector<1x4x32xf32>
    %6 = arith.select %2, %4, %5 : vector<1x4x32xi1>, vector<1x4x32xf32>
    %c0_3 = arith.constant 0 : index
    %c0_4 = arith.constant 0 : index
    %c0_5 = arith.constant 0 : index
    %7 = vector.load %arg2[%c0_3, %c0_4, %c0_5] : memref<1x4x32xf32, #tpu.memory_space<vmem>>, vector<1x4x32xf32>
    %cst_6 = arith.constant 0.000000e+00 : f32
    %8 = vector.broadcast %cst_6 : f32 to vector<1x4x32xf32>
    %9 = arith.cmpf ogt, %7, %8 : vector<1x4x32xf32>
    %cst_7 = arith.constant 1.000000e+00 : f32
    %10 = vector.broadcast %cst_7 : f32 to vector<1x4x32xf32>
    %11 = arith.addf %7, %10 : vector<1x4x32xf32>
    %12 = math.exp %7 : vector<1x4x32xf32>
    %13 = arith.select %9, %11, %12 : vector<1x4x32xi1>, vector<1x4x32xf32>
    %c0_8 = arith.constant 0 : index
    %c0_9 = arith.constant 0 : index
    %c0_10 = arith.constant 0 : index
    %14 = vector.load %arg3[%c0_8, %c0_9, %c0_10] : memref<1x4x32xf32, #tpu.memory_space<vmem>>, vector<1x4x32xf32>
    %c0_11 = arith.constant 0 : index
    %c0_12 = arith.constant 0 : index
    %c0_13 = arith.constant 0 : index
    %15 = vector.load %arg4[%c0_11, %c0_12, %c0_13] : memref<1x4x32xf32, #tpu.memory_space<vmem>>, vector<1x4x32xf32>
    %16 = arith.addf %15, %13 : vector<1x4x32xf32>
    %c0_14 = arith.constant 0 : index
    %c0_15 = arith.constant 0 : index
    %c0_16 = arith.constant 0 : index
    %c0_17 = arith.constant 0 : index
    %17 = vector.load %arg5[%c0_14, %c0_15, %c0_16, %c0_17] : memref<1x4x32x32xf32, #tpu.memory_space<vmem>>, vector<1x4x32x32xf32>
    %18 = vector.shape_cast %13 : vector<1x4x32xf32> to vector<1x4x32x1xf32>
    %19 = vector.shape_cast %14 : vector<1x4x32xf32> to vector<1x4x1x32xf32>
    %20 = vector.broadcast %18 : vector<1x4x32x1xf32> to vector<1x4x32x32xf32>
    %21 = vector.broadcast %19 : vector<1x4x1x32xf32> to vector<1x4x32x32xf32>
    %22 = arith.mulf %20, %21 : vector<1x4x32x32xf32>
    %23 = arith.addf %17, %22 : vector<1x4x32x32xf32>
    %24 = arith.mulf %6, %16 : vector<1x4x32xf32>
    %cst_18 = arith.constant dense<0.000000e+00> : vector<1x4xf32>
    %25 = vector.multi_reduction <add>, %24, %cst_18 [2] : vector<1x4x32xf32> to vector<1x4xf32>
    %26 = vector.shape_cast %25 : vector<1x4xf32> to vector<1x4x1xf32>
    %cst_19 = arith.constant 9.99999997E-7 : f32
    %27 = vector.broadcast %cst_19 : f32 to vector<1x4x1xf32>
    %28 = arith.addf %26, %27 : vector<1x4x1xf32>
    %29 = vector.shape_cast %6 : vector<1x4x32xf32> to vector<1x4x32x1xf32>
    %30 = vector.broadcast %29 : vector<1x4x32x1xf32> to vector<1x4x32x32xf32>
    %31 = arith.mulf %30, %23 : vector<1x4x32x32xf32>
    %cst_20 = arith.constant dense<0.000000e+00> : vector<1x4x32xf32>
    %32 = vector.multi_reduction <add>, %31, %cst_20 [2] : vector<1x4x32x32xf32> to vector<1x4x32xf32>
    %33 = vector.broadcast %28 : vector<1x4x1xf32> to vector<1x4x32xf32>
    %34 = arith.divf %32, %33 : vector<1x4x32xf32>
    %c0_21 = arith.constant 0 : index
    %c0_22 = arith.constant 0 : index
    %c0_23 = arith.constant 0 : index
    %35 = vector.load %arg6[%c0_21, %c0_22, %c0_23] : memref<1x4x32xf32, #tpu.memory_space<vmem>>, vector<1x4x32xf32>
    tpu.vector_store %arg6[%c0_21, %c0_22, %c0_23], %34 {strides = array<i32>} : memref<1x4x32xf32, #tpu.memory_space<vmem>>, vector<1x4x32xf32>,
    %c0_24 = arith.constant 0 : index
    %c0_25 = arith.constant 0 : index
    %c0_26 = arith.constant 0 : index
    %36 = vector.load %arg7[%c0_24, %c0_25, %c0_26] : memref<1x4x32xf32, #tpu.memory_space<vmem>>, vector<1x4x32xf32>
    tpu.vector_store %arg7[%c0_24, %c0_25, %c0_26], %16 {strides = array<i32>} : memref<1x4x32xf32, #tpu.memory_space<vmem>>, vector<1x4x32xf32>,
    %c0_27 = arith.constant 0 : index
    %c0_28 = arith.constant 0 : index
    %c0_29 = arith.constant 0 : index
    %c0_30 = arith.constant 0 : index
    %37 = vector.load %arg8[%c0_27, %c0_28, %c0_29, %c0_30] : memref<1x4x32x32xf32, #tpu.memory_space<vmem>>, vector<1x4x32x32xf32>
    tpu.vector_store %arg8[%c0_27, %c0_28, %c0_29, %c0_30], %23 {strides = array<i32>} : memref<1x4x32x32xf32, #tpu.memory_space<vmem>>, vector<1x4x32x32xf32>,
    %c0_31 = arith.constant 0 : index
    %c0_32 = arith.constant 0 : index
    %c0_33 = arith.constant 0 : index
    %38 = vector.load %arg9[%c0_31, %c0_32, %c0_33] : memref<1x4x32xf32, #tpu.memory_space<vmem>>, vector<1x4x32xf32>
    tpu.vector_store %arg9[%c0_31, %c0_32, %c0_33], %13 {strides = array<i32>} : memref<1x4x32xf32, #tpu.memory_space<vmem>>, vector<1x4x32xf32>,
    return
  }
  func.func @transform_0(%arg0: i32) -> (i32, i32, i32) {
    %c0_i32 = arith.constant 0 : i32
    %c0_i32_0 = arith.constant 0 : i32
    %c0_i32_1 = arith.constant 0 : i32
    return %arg0, %c0_i32, %c0_i32_0 : i32, i32, i32
  }
  func.func @transform_1(%arg0: i32) -> (i32, i32, i32) {
    %c0_i32 = arith.constant 0 : i32
    %c0_i32_0 = arith.constant 0 : i32
    %c0_i32_1 = arith.constant 0 : i32
    return %arg0, %c0_i32, %c0_i32_0 : i32, i32, i32
  }
  func.func @transform_2(%arg0: i32) -> (i32, i32, i32) {
    %c0_i32 = arith.constant 0 : i32
    %c0_i32_0 = arith.constant 0 : i32
    %c0_i32_1 = arith.constant 0 : i32
    return %arg0, %c0_i32, %c0_i32_0 : i32, i32, i32
  }
  func.func @transform_3(%arg0: i32) -> (i32, i32, i32) {
    %c0_i32 = arith.constant 0 : i32
    %c0_i32_0 = arith.constant 0 : i32
    %c0_i32_1 = arith.constant 0 : i32
    return %arg0, %c0_i32, %c0_i32_0 : i32, i32, i32
  }
  func.func @transform_4(%arg0: i32) -> (i32, i32, i32, i32) {
    %c0_i32 = arith.constant 0 : i32
    %c0_i32_0 = arith.constant 0 : i32
    %c0_i32_1 = arith.constant 0 : i32
    %c0_i32_2 = arith.constant 0 : i32
    return %arg0, %c0_i32, %c0_i32_0, %c0_i32_1 : i32, i32, i32, i32
  }
  func.func @transform_5(%arg0: i32) -> (i32, i32, i32) {
    %c0_i32 = arith.constant 0 : i32
    %c0_i32_0 = arith.constant 0 : i32
    %c0_i32_1 = arith.constant 0 : i32
    return %arg0, %c0_i32, %c0_i32_0 : i32, i32, i32
  }
  func.func @transform_6(%arg0: i32) -> (i32, i32, i32) {
    %c0_i32 = arith.constant 0 : i32
    %c0_i32_0 = arith.constant 0 : i32
    %c0_i32_1 = arith.constant 0 : i32
    return %arg0, %c0_i32, %c0_i32_0 : i32, i32, i32
  }
  func.func @transform_7(%arg0: i32) -> (i32, i32, i32, i32) {
    %c0_i32 = arith.constant 0 : i32
    %c0_i32_0 = arith.constant 0 : i32
    %c0_i32_1 = arith.constant 0 : i32
    %c0_i32_2 = arith.constant 0 : i32
    return %arg0, %c0_i32, %c0_i32_0, %c0_i32_1 : i32, i32, i32, i32
  }
  func.func @transform_8(%arg0: i32) -> (i32, i32, i32) {
    %c0_i32 = arith.constant 0 : i32
    %c0_i32_0 = arith.constant 0 : i32
    %c0_i32_1 = arith.constant 0 : i32
    return %arg0, %c0_i32, %c0_i32_0 : i32, i32, i32
  }
}

</mosaic_0001>

<bundles_post_ra>
// kernel: tpu_custom_call.1
= control target key start
LH: loop header
LB: loop body
LE: loop exit
PB: predicated region body
PF: predicated region fallthrough
CT: control target
= control target key end

     0   :  { %s1982_s0 = inlined_call_operand.vmem [shape: f32[2,4,32], index: 0, kind: input, shape index: {}]   ;;  %s1983_s1 = inlined_call_operand.vmem [shape: f32[2,4,32], index: 1, kind: input, shape index: {}]   ;;  %s1984_s2 = inlined_call_operand.vmem [shape: f32[2,4,32], index: 2, kind: input, shape index: {}]   ;;  %s1985_s3 = inlined_call_operand.hbm [shape: f32[2,4,32], index: 3, kind: input, shape index: {}, may-alias: {3,6}]   ;;  %s1986_s4 = inlined_call_operand.hbm [shape: f32[2,4,32,32], index: 4, kind: input, shape index: {}, may-alias: {4,7}]   ;;  %s1987_s5 = inlined_call_operand.hbm [shape: f32[2,4,32], index: 5, kind: output, shape index: {0}]   ;;  %s1988_s6 = inlined_call_operand.hbm [shape: f32[2,4,32], index: 6, kind: output, shape index: {1}, may-alias: {3,6}]   ;;  %s1989_s7 = inlined_call_operand.hbm [shape: f32[2,4,32,32], index: 7, kind: output, shape index: {2}, may-alias: {4,7}]   ;;  %s1990_s8 = inlined_call_operand.hbm [shape: f32[2,4,32], index: 8, kind: output, shape index: {3}]  }
   0x1   :  { %1995 = sst [smem:[#allocation19_spill]] %s1982_s0 }
   0x2   :  { %1996 = sst [smem:[#allocation20_spill]] %s1983_s1 }
   0x3   :  { %1997 = sst [smem:[#allocation21_spill]] %s1984_s2 }
   0x4   :  { %1998 = sst [smem:[#allocation22_spill]] %s1985_s3 }
   0x5   :  { %14 = vsyncpa [#allocation3], 0 }
   0x6   :  { %16 = vsyncpa [#allocation3 + $0x1], 0 }
   0x7   :  { %17 = vsyncpa [#allocation6], 0 }
   0x8   :  { %19 = vsyncpa [#allocation6 + $0x1], 0 }
   0x9   :  { %20 = vsyncpa [#allocation4], 0 }
   0xa   :  { %22 = vsyncpa [#allocation4 + $0x1], 0 }
   0xb   :  { %23 = vsyncpa [#allocation9], 0 }
   0xc   :  { %25 = vsyncpa [#allocation9 + $0x1], 0 }
   0xd   :  { %26 = vsyncpa [#allocation12], 0 }
   0xe   :  { %28 = vsyncpa [#allocation12 + $0x1], 0  ;;  %s1500_s27 = smov 0   ;;  %s1502_s28 = smov 0  }
   0xf   :  { %s1504_s29 = smov 0   ;;  %s1506_s30 = smov 0  }
  0x10 LB: > { %s1521_s9 = sadd.s32 4294967295, %s1442_s30   ;;  %s1991_s10 = sadd.s32 4294967294, %s1442_s30   ;;  %s1442_s30 = sphi %s1506_s30, %s2022_s30   ;;  %s1438_s29 = sphi %s1504_s29, %s2021_s29   ;;  %s1434_s28 = sphi %s1502_s28, %s2020_s28   ;;  %s1430_s27 = sphi %s1500_s27, %s2019_s27  }
  0x11   : > { %s1525_s11 = sadd.s32 1, %s1442_s30   ;;  %s119_s12 = sadd.s32 1, %s1438_s29 }
  0x12   : > { %s116_s13 = ssub.s32 %s1442_s30, %s1525_s11  ;;  %p126_p0 = scmp.ne.s32.totalorder %s1438_s29, %s1434_s28 }
  0x13   : > { %p117_p1 = scmp.eq.s32.totalorder %s116_s13, 0  ;;  %p127_p2 = scmp.eq.s32.totalorder %s1442_s30, 0 }
  0x14   : > { %p132_p3 = scmp.ne.s32.totalorder %s1434_s28, %s1430_s27  ;;  %p133_p4 = scmp.eq.s32.totalorder %s1521_s9, 0 }
  0x15   : > { %s1537_s14 = scalar_select %p117_p1, %s1438_s29, %s119_s12  }
  0x16   : > { %p1539_p5 = por %p127_p2, %p126_p0  ;;  %p1543_p6 = por %p133_p4, %p132_p3 }
  0x17   : > { %1999 = sst [smem:[#allocation18_spill]] %s1537_s14  ;;  %p182_p7 = scmp.eq.s32.totalorder %s1521_s9, 1 }
  0x18   : > { %s2001_s16 = scalar_select %p1543_p6, 1, 0 }
  0x19   : > { %p188_p8 = scmp.eq.s32.totalorder %s1991_s10, 1  ;;  %p1181_p10 = scmp.lt.s32.totalorder %s1442_s30, 2 }
  0x1a   : > { %p1552_p11 = por %p182_p7, %p126_p0  ;;  %s1561_s19 = sand.u32 1, %s1438_s29  }
  0x1b   : > { %p1556_p12 = por %p188_p8, %p132_p3  ;;  %s1121_s20 = sshll.u32 %s1442_s30, 6 }
  0x1c   : > { %s2002_s17 = scalar_select %p1552_p11, 1, 0 }
  0x1d   : > { %s2003_s18 = scalar_select %p1556_p12, 1, 0 }
  0x1e   : > { %s1120_s21 = sshll.u32 %s1561_s19, 2  ;;  %s2004_s3 = sld [smem:[#allocation22_spill]] }
  0x1f   : > { %s311_s25 = scalar_lea.vmem [#allocation2], %s1120_s21  ;;  %p1572_p13 = pnand %p1181_p10, %p1539_p5 }
  0x20   : > { %s318_s26 = sshll.u32 %s311_s25, 4  ;;  %s308_s13 = scalar_lea.sflag [#allocation3], %s1561_s19  ;;  %s1576_s26 = int_to_ptr.vmem [resolvable:$true] %s318_s26 }
  0x21   : > { %p1234_p3 = pneg %p1572_p13 }
  0x24   : > { %s1568_s24 = scalar_lea.hbm %s2004_s3, %s1121_s20  ;;  %s1237_s21 = scalar_lea.hbm %s2004_s3, 128 }
  0x25   : > { %s1232_s22 = scalar_lea.hbm %s1568_s24, 64  ;;  %p1238_p5 = scmp.lt.s32.totalorder %s1568_s24, %s2004_s3 }
  0x26   : > { %p1233_p2 = scmp.ne.s32.totalorder %s1568_s24, %s1232_s22  ;;  %p1239_p8 = scmp.lt.s32.totalorder %s1237_s21, %s1232_s22 }
  0x28   : > { %p1235_p4 = pnand %p1234_p3, %p1233_p2  ;;  %p1240_p10 = por %p1239_p8, %p1238_p5 }
  0x2a   : > { %p1236_p7 = pneg %p1235_p4 }
  0x2c   : > { %p1241_p9 = pnand %p1240_p10, %p1236_p7 }
  0x2e   : > { %1244 = shalt.err (!%p1241_p9)
}
  0x2f   : > { %s1245_s10 = scalar_lea.vmem %s1576_s26, 64  ;;  %s1444_s15 = smov [#allocation2]  }
  0x30   : > { %p1246_p0 = scmp.ne.s32.totalorder %s1576_s26, %s1245_s10  ;;  %s1250_s20 = sshll.u32 %s1444_s15, 4  ;;  %s1251_s20 = int_to_ptr.vmem [resolvable:$false] %s1250_s20 }
  0x31   : > { %s1252_s14 = scalar_lea.vmem %s1251_s20, 128  ;;  %p1253_p1 = scmp.lt.s32.totalorder %s1576_s26, %s1251_s20 }
  0x32   : > { %p1248_p2 = pnand %p1246_p0, %p1234_p3  ;;  %p1254_p12 = scmp.lt.s32.totalorder %s1252_s14, %s1245_s10 }
  0x34   : > { %p1249_p4 = pneg %p1248_p2  ;;  %p1255_p11 = por %p1254_p12, %p1253_p1 }
  0x36   : > { %p1256_p5 = pnand %p1255_p11, %p1249_p4 }
  0x38   : > { %1259 = shalt.err (!%p1256_p5)
}
  0x39   : > { %1164 = dma.hbm_to_vmem [thread:$0]  (!%p1572_p13), %s1568_s24, 64, %s1576_s26, %s308_s13  }
  0x3a   : > { %p2006_p9 = scmp.lt.s32.totalorder %s1442_s30, 3  ;;  %p2007_p0 = scmp.ge.s32.totalorder %s1442_s30, 1 }
  0x3b   : > { %s1122_s10 = sshll.u32 %s1561_s19, 7  ;;  %s1147_s14 = sshll.u32 %s1442_s30, 11 }
  0x3c   : > { %p1609_p7 = pnand %p2007_p0, %p2006_p9  ;;  %s1618_s25 = scalar_lea.hbm %s1986_s4, %s1147_s14 }
  0x3d   : > { %s329_s15 = scalar_lea.vmem [#allocation5], %s1122_s10  ;;  %s326_s24 = scalar_lea.sflag [#allocation6], %s1561_s19 }
  0x3e   : > { %s336_s20 = sshll.u32 %s329_s15, 4  ;;  %s1260_s26 = scalar_lea.hbm %s1618_s25, 2048  ;;  %s1620_s20 = int_to_ptr.vmem [resolvable:$true] %s336_s20 }
  0x3f   : > { %p1261_p11 = scmp.ne.s32.totalorder %s1618_s25, %s1260_s26  ;;  %s1265_s21 = scalar_lea.hbm %s1986_s4, 4096 }
  0x40   : > { %p1266_p8 = scmp.lt.s32.totalorder %s1618_s25, %s1986_s4  ;;  %p1267_p10 = scmp.lt.s32.totalorder %s1265_s21, %s1260_s26 }
  0x41   : > { %p1263_p12 = pnand %p1261_p11, %p1234_p3 }
  0x42   : > { %p1268_p2 = por %p1267_p10, %p1266_p8 }
  0x43   : > { %p1264_p1 = pneg %p1263_p12 }
  0x45   : > { %p1269_p4 = pnand %p1268_p2, %p1264_p1 }
  0x47   : > { %1272 = shalt.err (!%p1269_p4)
}
  0x48   : > { %s1273_s10 = scalar_lea.vmem %s1620_s20, 2048  ;;  %s1445_s3 = smov [#allocation5]  }
  0x49   : > { %p1274_p5 = scmp.ne.s32.totalorder %s1620_s20, %s1273_s10  ;;  %s1278_s15 = sshll.u32 %s1445_s3, 4  ;;  %s1279_s15 = int_to_ptr.vmem [resolvable:$false] %s1278_s15 }
  0x4a   : > { %s1280_s13 = scalar_lea.vmem %s1279_s15, 4096  ;;  %p1281_p11 = scmp.lt.s32.totalorder %s1620_s20, %s1279_s15 }
  0x4b   : > { %p1276_p9 = pnand %p1274_p5, %p1234_p3  ;;  %p1282_p12 = scmp.lt.s32.totalorder %s1280_s13, %s1273_s10 }
  0x4d   : > { %p1277_p0 = pneg %p1276_p9  ;;  %p1283_p6 = por %p1282_p12, %p1281_p11 }
  0x4f   : > { %p1284_p8 = pnand %p1283_p6, %p1277_p0 }
  0x51   : > { %1287 = shalt.err (!%p1284_p8)
}
  0x52   : > { %s1446_s26 = smov 128   ;;  %s1447_s21 = smov 8  }
  0x53   : > { %1167 = dma.hbm_to_vmem [thread:$0]  (!%p1572_p13), %s1618_s25, 2048, %s1620_s20, %s326_s24, %s1446_s26, %s1446_s26, %s1447_s21  }
  0x54   : > { %348 = sbr.rel (%p1609_p7) target bundleno = 381 (0x17d), region = 40  ;;  %s1650_s14 = sand.u32 (!%p1609_p7), 1, %s1434_s28  }
  0x55   : > { %s1653_s23 = sshll.u32 (!%p1609_p7), %s1650_s14, 2  ;;  %s351_s10 = scalar_lea.sflag (!%p1609_p7), [#allocation3], %s1650_s14 }
  0x56   : > { %s354_s3 = scalar_lea.vmem (!%p1609_p7), [#allocation2], %s1653_s23  ;;  %p2009_p6 = scmp.ne.s32.totalorder (!%p1609_p7), %s2001_s16, 0 }
  0x59   : > { %1409 = dma.done.wait (%p2009_p6), %s351_s10, 64  }
  0x5a   : > { %1411 = vsyncadd (%p2009_p6), %s351_s10, 4294967232  ;;  %s1994_s19 = sshll.u32 %s1650_s14, 7  ;;  %s360_s12 = scalar_lea.sflag [#allocation6], %s1650_s14 }
  0x5b   : > { %s1665_s22 = scalar_lea.vmem [#allocation5], %s1994_s19 }
  0x5c   : > { %1413 = dma.done.wait (%p2009_p6), %s360_s12, 2048  }
  0x5d   : > { %1415 = vsyncadd (%p2009_p6), %s360_s12, 4294965248  ;;  %p428_p13 = scmp.lt.s32.totalorder %s1521_s9, 1  ;;  %v1448_v0 = vmov 1966171168   ;;  %v471_v2 = vlaneseq  ;;  %s2010_s1 = sld [smem:[#allocation20_spill]]  ;;  %vm625_vm2 = vcmask 257024  }
  0x5e   : > { %v557_v1 = vunpack.c.l.s4 %v1448_v0  ;;  %s2011_s2 = sld [smem:[#allocation21_spill]]  ;;  %v453_v32 = vld [vmem:[%s354_s3] sm:$0xf]  ;;  %s829_s3 = sand.u32 1, %s1521_s9  }
  0x5f   : > { %s429_s25 = scalar_select %p428_p13, %s1521_s9, 1  ;;  %v472_v5 = vshrl.u32 %v471_v2, 7 }
  0x60   : > { %v558_v3 = vunpack.c.0.s8 %v557_v1  ;;  %s2012_s0 = sld [smem:[#allocation19_spill]]  ;;  %s1709_s24 = sshll.u32 %s1521_s9, 6 }
  0x61   : > { %s1673_s20 = sshll.u32 %s429_s25, 2  ;;  %v473_v10 = vsub.s32 0, %v472_v5  ;;  %v492_v20 = vsub.s32 1, %v472_v5  ;;  %v511_v22 = vsub.s32 2, %v472_v5  ;;  %v530_v23 = vsub.s32 3, %v472_v5  ;;  %s864_s16 = scalar_lea.hbm %s1988_s6, %s1709_s24 }
  0x62   : > { %v561_v7 = vsub.s32 %v558_v3, %v472_v5  ;;  %p2013_p7 = scmp.ne.s32.totalorder %s2002_s17, 0  ;;  %s1449_s12 = smov [#allocation8]  }
  0x63   : > { %s435_s13 = scalar_lea.vmem %s2010_s1, %s1673_s20 }
  0x64   : > { %v446_v4 = vld [vmem:[%s435_s13] sm:$0xf]  ;;  %s439_s21 = scalar_lea.vmem %s2011_s2, %s1673_s20 }
  0x65   : > { %v449_v6 = vmul.f32 1.442695, %v446_v4  ;;  %v1135_v8 = vld.sshfl [vmem:[%s439_s21] sm:$0x33 pattern:$0x75316420] }
  0x66   : > { %v555_v9 = vcombine.high %v1135_v8, %v1135_v8  ;;  %v562_v12 = vrot.slane %v1135_v8, %v561_v7  ;;  %v448_v18 = vadd.f32 1.0, %v446_v4  ;;  %vm447_vm0 = vcmp.gt.f32.partialorder %v446_v4, 0.0  ;;  %s431_s25 = scalar_lea.vmem %s2012_s0, %s1673_s20  ;;  %s413_s20 = scalar_lea.vmem [#allocation8], %s1653_s23 }
  0x67   : > { %1220 = vpow2.f32 %v449_v6  ;;  %v440_v29 = vld [vmem:[%s431_s25] sm:$0xf]  ;;  %s866_s26 = sshll.u32 %s413_s20, 4  ;;  %s1715_s21 = scalar_lea.sflag [#allocation9], %s829_s3  ;;  %s867_s26 = int_to_ptr.vmem [resolvable:$true] %s866_s26 }
  0x68   : > { %v569_v11 = vrot.slane %v555_v9, %v561_v7  ;;  %v570_v15 = vcombine.high %v562_v12, %v562_v12  ;;  %v1689_v19 = vrot.slane %v562_v12, %v473_v10  ;;  %v443_v30 = vmul.f32 1.442695, %v440_v29  ;;  %s1288_s10 = scalar_lea.vmem %s867_s26, 64  ;;  %s1292_s25 = sshll.u32 %s1449_s12, 4  ;;  %s1293_s25 = int_to_ptr.vmem [resolvable:$false] %s1292_s25 }
  0x69   : > { %v442_v31 = vadd.f32 1.0, %v440_v29  ;;  %vm441_vm1 = vcmp.gt.f32.partialorder %v440_v29, 0.0  ;;  %p1289_p3 = scmp.ne.s32.totalorder %s867_s26, %s1288_s10  ;;  %s1294_s19 = scalar_lea.vmem %s1293_s25, 128 }
  0x6a   : > { %v1683_v13 = vrot.slane %v569_v11, %v473_v10  ;;  %v571_v14 = vcombine.high %v569_v11, %v569_v11  ;;  %v1687_v17 = vrot.slane %v570_v15, %v473_v10  ;;  %1222 = vpow2.f32 %v443_v30  ;;  %p1295_p2 = scmp.lt.s32.totalorder %s867_s26, %s1293_s25  ;;  %p1296_p4 = scmp.lt.s32.totalorder %s1294_s19, %s1288_s10 }
  0x6b   : > { %p1290_p1 = pnand %p1289_p3, %p2013_p7 }
  0x6c   : > { %v1685_v16 = vrot.slane %v571_v14, %v473_v10  ;;  %p1297_p5 = por %p1296_p4, %p1295_p2 }
  0x6d   : > { %p1291_p10 = pneg %p1290_p1 }
  0x6f   : > { %p1298_p9 = pnand %p1297_p5, %p1291_p10 }
  0x74   : > { %v1221_v21 = vpop.eup %1220 }
  0x75   : > { %v1691_v24 = vsel %vm447_vm0, %v448_v18, %v1221_v21 }
  0x76   : > { %v493_v25 = vrot.slane %v1691_v24, %v492_v20  ;;  %v512_v26 = vrot.slane %v1691_v24, %v511_v22  ;;  %v531_v27 = vrot.slane %v1691_v24, %v530_v23  ;;  %v474_v28 = vrot.slane %v1691_v24, %v473_v10 }
  0x77   : > { %v1223_v33 = vpop.eup %1222  ;;  %v454_v34 = vadd.f32 %v453_v32, %v1691_v24 }
  0x78   : > { %499 = vbcast.lane.b32.xlu1 %v493_v25, 264  ;;  %495 = vbcast.lane.b32.xlu0 %v493_v25, 256  ;;  %v445_v35 = vsel %vm441_vm1, %v442_v31, %v1223_v33 }
  0x79   : > { %v652_v36 = vrot.slane %v445_v35, %v492_v20  ;;  %v624_v37 = vmul.f32 %v454_v34, %v445_v35  ;;  %v671_v39 = vrot.slane %v445_v35, %v511_v22  ;;  %v633_v40 = vrot.slane %v445_v35, %v473_v10  ;;  %806 = vst.msk [vmem:[%s413_s20] sm:$0xf] %vm625_vm2, %v454_v34 }
  0x7a   : > { %v690_v41 = vrot.slane %v445_v35, %v530_v23 }
  0x7b   : > { %v626_v38 = vsel %vm625_vm2, %v624_v37, 0.0 }
  0x7c   : > { %514 = vbcast.lane.b32.xlu1 %v512_v26, 256  ;;  %537 = vbcast.lane.b32.xlu0 %v531_v27, 264 }
  0x80   : > { %518 = vbcast.lane.b32.xlu1 %v512_v26, 264  ;;  %484 = vbcast.lane.b32.xlu0 %v474_v28, 272 }
  0x84   : > { %476 = vbcast.lane.b32.xlu1 %v474_v28, 256 }
  0x88   : > { %480 = vbcast.lane.b32.xlu1 %v474_v28, 264 }
  0x8c   : > { %503 = vbcast.lane.b32.xlu1 %v493_v25, 272 }
  0x90   : > { %533 = vbcast.lane.b32.xlu1 %v531_v27, 256 }
  0x94   : > { %522 = vbcast.lane.b32.xlu1 %v512_v26, 272 }
  0x98   : > { %507 = vbcast.lane.b32.xlu1 %v493_v25, 280 }
  0x9c   : > { %654 = vbcast.lane.b32.xlu1 %v652_v36, 256 }
  0x9f   : > { %627 = vadd.xlane.f32.xlu0 %v626_v38 }
  0xa0   : > { %526 = vbcast.lane.b32.xlu1 %v512_v26, 280 }
  0xa4   : > { %677 = vbcast.lane.b32.xlu1 %v671_v39, 264 }
  0xa8   : > { %545 = vbcast.lane.b32.xlu1 %v531_v27, 280 }
  0xac   : > { %639 = vbcast.lane.b32.xlu1 %v633_v40, 264 }
  0xb0   : > { %692 = vbcast.lane.b32.xlu1 %v690_v41, 256 }
  0xb4   : > { %681 = vbcast.lane.b32.xlu1 %v671_v39, 272 }
  0xb5   : > { %541 = vbcast.lane.b32.xlu0 %v531_v27, 272 }
  0xb8   : > { %666 = vbcast.lane.b32.xlu1 %v652_v36, 280 }
  0xb9   : > { %658 = vbcast.lane.b32.xlu0 %v652_v36, 264 }
  0xbc   : > { %685 = vbcast.lane.b32.xlu1 %v671_v39, 280 }
  0xbd   : > { %673 = vbcast.lane.b32.xlu0 %v671_v39, 256 }
  0xc0   : > { %704 = vbcast.lane.b32.xlu1 %v690_v41, 280 }
  0xc1   : > { %488 = vbcast.lane.b32.xlu0 %v474_v28, 280 }
  0xc5   : > { %635 = vbcast.lane.b32.xlu0 %v633_v40, 256 }
  0xc9   : > { %662 = vbcast.lane.b32.xlu0 %v652_v36, 272 }
  0xcd   : > { %696 = vbcast.lane.b32.xlu0 %v690_v41, 264 }
  0xd1   : > { %643 = vbcast.lane.b32.xlu0 %v633_v40, 272 }
  0xd5   : > { %700 = vbcast.lane.b32.xlu0 %v690_v41, 272 }
  0xd9   : > { %647 = vbcast.lane.b32.xlu0 %v633_v40, 280 }
  0xda   : > { %1301 = shalt.err (!%p1298_p9)
}
  0xdb   : > { %s1302_s15 = scalar_lea.hbm %s864_s16, 64  ;;  %s1306_s13 = scalar_lea.hbm %s1988_s6, 128 }
  0xdc   : > { %p1303_p0 = scmp.ne.s32.totalorder %s864_s16, %s1302_s15  ;;  %p1307_p8 = scmp.lt.s32.totalorder %s864_s16, %s1988_s6 }
  0xdd   : > { %p1308_p6 = scmp.lt.s32.totalorder %s1306_s13, %s1302_s15 }
  0xde   : > { %p1304_p11 = pnand %p1303_p0, %p2013_p7 }
  0xdf   : > { %p1309_p13 = por %p1308_p6, %p1307_p8 }
  0xe0   : > { %p1305_p12 = pneg %p1304_p11 }
  0xe2   : > { %p1310_p3 = pnand %p1309_p13, %p1305_p12 }
  0xe4   : > { %1313 = shalt.err (!%p1310_p3)
}
  0xe5   : > { %1154 = dma.vmem_to_hbm [thread:$0]  (%p2013_p7), %s867_s26, 64, %s864_s16, %s1715_s21   ;;  %v459_v44 = vld [vmem:[%s1665_s22 + $0x20] sm:$0xff]  ;;  %v460_v45 = vld [vmem:[%s1665_s22 + $0x28] sm:$0xff]  ;;  %vm722_vm3 = vcmask 261120  }
  0xe6   : > { %s427_s0 = scalar_lea.vmem [#allocation11], %s1653_s23  ;;  %s1745_s16 = scalar_lea.hbm %s1990_s8, %s1709_s24  ;;  %v463_v52 = vld [vmem:[%s1665_s22 + $0x40] sm:$0xff]  ;;  %v468_v53 = vld [vmem:[%s1665_s22 + $0x68] sm:$0xff] }
  0xe7   : > { %823 = vst.msk [vmem:[%s427_s0] sm:$0xf] %vm625_vm2, %v1691_v24  ;;  %s895_s26 = sshll.u32 %s427_s0, 4  ;;  %s2014_s10 = sshll.u32 %s1650_s14, 7  ;;  %s1749_s26 = int_to_ptr.vmem [resolvable:$true] %s895_s26 }
  0xe8   : > { %s1755_s12 = scalar_lea.vmem [#allocation10], %s2014_s10  ;;  %s840_s25 = scalar_lea.sflag [#allocation12], %s1650_s14 }
  0xe9   : > { %s1314_s15 = scalar_lea.vmem %s1749_s26, 64  ;;  %s1450_s3 = smov [#allocation11]  }
  0xea   : > { %v500_v42 = vpop.permute.xlu1 %499  ;;  %v496_v43 = vpop.permute.xlu0 %495  ;;  %p1315_p1 = scmp.ne.s32.totalorder %s1749_s26, %s1314_s15  ;;  %s1318_s20 = sshll.u32 %s1450_s3, 4  ;;  %s1319_s20 = int_to_ptr.vmem [resolvable:$false] %s1318_s20 }
  0xeb   : > { %v597_v46 = vmul.f32 %v1683_v13, %v500_v42  ;;  %v596_v47 = vmul.f32 %v1683_v13, %v496_v43  ;;  %s1320_s13 = scalar_lea.vmem %s1319_s20, 128  ;;  %p1321_p4 = scmp.lt.s32.totalorder %s1749_s26, %s1319_s20 }
  0xec   : > { %p1316_p10 = pnand %p1315_p1, %p2013_p7  ;;  %p1322_p5 = scmp.lt.s32.totalorder %s1320_s13, %s1314_s15 }
  0xed   : > { %v1734_v48 = vadd.f32 %v596_v47, %v459_v44  ;;  %v1736_v49 = vadd.f32 %v597_v46, %v460_v45 }
  0xee   : > { %v515_v50 = vpop.permute.xlu1 %514  ;;  %v538_v51 = vpop.permute.xlu0 %537  ;;  %p1317_p2 = pneg %p1316_p10  ;;  %p1323_p9 = por %p1322_p5, %p1321_p4 }
  0xef   : > { %v600_v54 = vmul.f32 %v1687_v17, %v515_v50  ;;  %v605_v55 = vmul.f32 %v1685_v16, %v538_v51  ;;  %811 = vst.msk [vmem:[%s1755_s12 + $0x20] sm:$0xff] %vm722_vm3, %v1734_v48  ;;  %812 = vst.msk [vmem:[%s1755_s12 + $0x28] sm:$0xff] %vm722_vm3, %v1736_v49 }
  0xf0   : > { %p1324_p0 = pnand %p1323_p9, %p1317_p2 }
  0xf2   : > { %1327 = shalt.err (!%p1324_p0)
}
  0xf3   : > { %s1328_s0 = scalar_lea.hbm %s1745_s16, 64  ;;  %s1332_s10 = scalar_lea.hbm %s1990_s8, 128 }
  0xf4   : > { %p1329_p11 = scmp.ne.s32.totalorder %s1745_s16, %s1328_s0  ;;  %p1333_p6 = scmp.lt.s32.totalorder %s1745_s16, %s1990_s8 }
  0xf5   : > { %p1334_p13 = scmp.lt.s32.totalorder %s1332_s10, %s1328_s0 }
  0xf6   : > { %p1330_p12 = pnand %p1329_p11, %p2013_p7 }
  0xf7   : > { %p1335_p3 = por %p1334_p13, %p1333_p6 }
  0xf8   : > { %p1331_p8 = pneg %p1330_p12 }
  0xfa   : > { %p1336_p1 = pnand %p1335_p3, %p1331_p8 }
  0xfc   : > { %1339 = shalt.err (!%p1336_p1)
}
  0xfd   : > { %1156 = dma.vmem_to_hbm [thread:$0]  (%p2013_p7), %s1749_s26, 64, %s1745_s16, %s840_s25   ;;  %v1784_v56 = vadd.f32 %v600_v54, %v463_v52  ;;  %v1786_v57 = vadd.f32 %v605_v55, %v468_v53  ;;  %v519_v58 = vpop.permute.xlu1 %518  ;;  %v485_v59 = vpop.permute.xlu0 %484  ;;  %v464_v60 = vld [vmem:[%s1665_s22 + $0x48] sm:$0xff]  ;;  %v457_v61 = vld [vmem:[%s1665_s22 + $0x10] sm:$0xff]  ;;  %v455_v3 = vld [vmem:[%s1665_s22] sm:$0xff] }
  0xfe   : > { %v601_v62 = vmul.f32 %v1687_v17, %v519_v58  ;;  %v594_v63 = vmul.f32 %v1689_v19, %v485_v59  ;;  %v456_v7 = vld [vmem:[%s1665_s22 + $0x8] sm:$0xff]  ;;  %v461_v11 = vld [vmem:[%s1665_s22 + $0x30] sm:$0xff]  ;;  %v467_v18 = vld [vmem:[%s1665_s22 + $0x60] sm:$0xff]  ;;  %s1148_s2 = sshll.u32 %s1521_s9, 11  ;;  %s879_s16 = sshll.u32 %s1755_s12, 4  ;;  %s1885_s16 = int_to_ptr.vmem [resolvable:$true] %s879_s16 }
  0xff   : > { %815 = vst.msk [vmem:[%s1755_s12 + $0x40] sm:$0xff] %vm722_vm3, %v1784_v56  ;;  %820 = vst.msk [vmem:[%s1755_s12 + $0x68] sm:$0xff] %vm722_vm3, %v1786_v57  ;;  %v465_v23 = vld [vmem:[%s1665_s22 + $0x50] sm:$0xff]  ;;  %v462_v27 = vld [vmem:[%s1665_s22 + $0x38] sm:$0xff]  ;;  %s1879_s15 = scalar_lea.hbm %s1989_s7, %s1148_s2  ;;  %s1340_s9 = scalar_lea.vmem %s1885_s16, 2048 }
 0x100   : > { %v617_v0 = vadd.f32 %v601_v62, %v464_v60  ;;  %v1798_v1 = vadd.f32 %v594_v63, %v457_v61  ;;  %v466_v32 = vld [vmem:[%s1665_s22 + $0x58] sm:$0xff]  ;;  %v469_v43 = vld [vmem:[%s1665_s22 + $0x70] sm:$0xff]  ;;  %p1341_p10 = scmp.ne.s32.totalorder %s1885_s16, %s1340_s9 }
 0x101   : > { %v477_v2 = vpop.permute.xlu1 %476  ;;  %v458_v61 = vld [vmem:[%s1665_s22 + $0x18] sm:$0xff] }
 0x102   : > { %v592_v4 = vmul.f32 %v1689_v19, %v477_v2  ;;  %816 = vst.msk [vmem:[%s1755_s12 + $0x48] sm:$0xff] %vm722_vm3, %v617_v0  ;;  %809 = vst.msk [vmem:[%s1755_s12 + $0x10] sm:$0xff] %vm722_vm3, %v1798_v1  ;;  %p1342_p2 = pnand %p1341_p10, %p2013_p7 }
 0x104   : > { %v1807_v5 = vadd.f32 %v592_v4, %v455_v3  ;;  %p1343_p4 = pneg %p1342_p2 }
 0x105   : > { %v481_v6 = vpop.permute.xlu1 %480 }
 0x106   : > { %v593_v8 = vmul.f32 %v1689_v19, %v481_v6  ;;  %807 = vst.msk [vmem:[%s1755_s12] sm:$0xff] %vm722_vm3, %v1807_v5 }
 0x108   : > { %v1814_v9 = vadd.f32 %v593_v8, %v456_v7 }
 0x109   : > { %v504_v10 = vpop.permute.xlu1 %503 }
 0x10a   : > { %v598_v12 = vmul.f32 %v1683_v13, %v504_v10  ;;  %808 = vst.msk [vmem:[%s1755_s12 + $0x8] sm:$0xff] %vm722_vm3, %v1814_v9 }
 0x10c   : > { %v1821_v14 = vadd.f32 %v598_v12, %v461_v11 }
 0x10d   : > { %v534_v15 = vpop.permute.xlu1 %533 }
 0x10e   : > { %v604_v20 = vmul.f32 %v1685_v16, %v534_v15  ;;  %813 = vst.msk [vmem:[%s1755_s12 + $0x30] sm:$0xff] %vm722_vm3, %v1821_v14 }
 0x110   : > { %v1828_v21 = vadd.f32 %v604_v20, %v467_v18 }
 0x111   : > { %v523_v22 = vpop.permute.xlu1 %522 }
 0x112   : > { %v602_v24 = vmul.f32 %v1687_v17, %v523_v22  ;;  %819 = vst.msk [vmem:[%s1755_s12 + $0x60] sm:$0xff] %vm722_vm3, %v1828_v21 }
 0x114   : > { %v618_v25 = vadd.f32 %v602_v24, %v465_v23 }
 0x115   : > { %v508_v26 = vpop.permute.xlu1 %507 }
 0x116   : > { %v599_v28 = vmul.f32 %v1683_v13, %v508_v26  ;;  %817 = vst.msk [vmem:[%s1755_s12 + $0x50] sm:$0xff] %vm722_vm3, %v618_v25  ;;  %v470_v13 = vld [vmem:[%s1665_s22 + $0x78] sm:$0xff]  ;;  %s1451_s22 = smov [#allocation10]  }
 0x117   : > { %s1344_s20 = sshll.u32 %s1451_s22, 4  ;;  %s1345_s20 = int_to_ptr.vmem [resolvable:$false] %s1344_s20 }
 0x118   : > { %v1839_v29 = vadd.f32 %v599_v28, %v462_v27  ;;  %s1346_s13 = scalar_lea.vmem %s1345_s20, 4096  ;;  %p1347_p5 = scmp.lt.s32.totalorder %s1885_s16, %s1345_s20 }
 0x119   : > { %v655_v30 = vpop.permute.xlu1 %654  ;;  %p1348_p9 = scmp.lt.s32.totalorder %s1346_s13, %s1340_s9 }
 0x11a   : > { %814 = vst.msk [vmem:[%s1755_s12 + $0x38] sm:$0xff] %vm722_vm3, %v1839_v29 }
 0x11b   : > { %p1349_p0 = por %p1348_p9, %p1347_p5 }
 0x11d   : > { %v527_v31 = vpop.permute.xlu1 %526  ;;  %p1350_p11 = pnand %p1349_p0, %p1343_p4 }
 0x11e   : > { %v603_v33 = vmul.f32 %v1687_v17, %v527_v31 }
 0x120   : > { %v619_v34 = vadd.f32 %v603_v33, %v466_v32 }
 0x121   : > { %v678_v35 = vpop.permute.xlu1 %677 }
 0x122   : > { %818 = vst.msk [vmem:[%s1755_s12 + $0x58] sm:$0xff] %vm722_vm3, %v619_v34  ;;  %v715_v50 = vmul.f32 %v678_v35, %v617_v0 }
 0x124   : > { %v750_v55 = vsel %vm722_vm3, %v715_v50, 0.0 }
 0x125   : > { %v546_v36 = vpop.permute.xlu1 %545 }
 0x126   : > { %v607_v37 = vmul.f32 %v1685_v16, %v546_v36 }
 0x128   : > { %v1850_v38 = vadd.f32 %v607_v37, %v470_v13  ;;  %v1859_v41 = vpop.xlane.xlu0 %627 }
 0x129   : > { %v1855_v39 = vpop.permute.xlu1 %639 }
 0x12a   : > { %822 = vst.msk [vmem:[%s1755_s12 + $0x78] sm:$0xff] %vm722_vm3, %v1850_v38 }
 0x12c   : > { %v542_v42 = vpop.permute.xlu0 %541 }
 0x12d   : > { %v1857_v40 = vpop.permute.xlu1 %692  ;;  %v606_v44 = vmul.f32 %v1685_v16, %v542_v42 }
 0x12f   : > { %v1863_v45 = vadd.f32 %v606_v44, %v469_v43 }
 0x130   : > { %v659_v47 = vpop.permute.xlu0 %658 }
 0x131   : > { %v682_v17 = vpop.permute.xlu1 %681  ;;  %821 = vst.msk [vmem:[%s1755_s12 + $0x70] sm:$0xff] %vm722_vm3, %v1863_v45 }
 0x132   : > { %v716_v53 = vmul.f32 %v682_v17, %v618_v25 }
 0x134   : > { %v674_v52 = vpop.permute.xlu0 %673  ;;  %v752_v62 = vsel %vm722_vm3, %v716_v53, 0.0 }
 0x135   : > { %v667_v46 = vpop.permute.xlu1 %666  ;;  %v714_v54 = vmul.f32 %v674_v52, %v1784_v56  ;;  %v711_v56 = vmul.f32 %v659_v47, %v1736_v49 }
 0x137   : > { %v749_v16 = vsel %vm722_vm3, %v714_v54, 0.0 }
 0x138   : > { %v751_v59 = vadd.f32 %v750_v55, %v749_v16  ;;  %v489_v60 = vpop.permute.xlu0 %488 }
 0x139   : > { %v686_v51 = vpop.permute.xlu1 %685  ;;  %v595_v63 = vmul.f32 %v1689_v19, %v489_v60  ;;  %v710_v19 = vmul.f32 %v655_v30, %v1734_v48 }
 0x13a   : > { %v717_v58 = vmul.f32 %v686_v51, %v619_v34  ;;  %v753_v0 = vadd.f32 %v752_v62, %v751_v59 }
 0x13b   : > { %v1883_v3 = vadd.f32 %v595_v63, %v458_v61 }
 0x13c   : > { %v754_v2 = vsel %vm722_vm3, %v717_v58, 0.0  ;;  %v636_v6 = vpop.permute.xlu0 %635 }
 0x13d   : > { %v755_v4 = vadd.f32 %v754_v2, %v753_v0  ;;  %810 = vst.msk [vmem:[%s1755_s12 + $0x18] sm:$0xff] %vm722_vm3, %v1883_v3 }
 0x13e   : > { %1353 = shalt.err (!%p1350_p11)
}
 0x13f   : > { %s1354_s0 = scalar_lea.hbm %s1879_s15, 2048  ;;  %s1358_s19 = scalar_lea.hbm %s1989_s7, 4096 }
 0x140   : > { %p1355_p12 = scmp.ne.s32.totalorder %s1879_s15, %s1354_s0  ;;  %p1359_p13 = scmp.lt.s32.totalorder %s1879_s15, %s1989_s7 }
 0x141   : > { %p1360_p3 = scmp.lt.s32.totalorder %s1358_s19, %s1354_s0 }
 0x142   : > { %p1356_p8 = pnand %p1355_p12, %p2013_p7 }
 0x143   : > { %p1361_p1 = por %p1360_p3, %p1359_p13 }
 0x144   : > { %p1357_p6 = pneg %p1356_p8 }
 0x146   : > { %p1362_p10 = pnand %p1361_p1, %p1357_p6 }
 0x148   : > { %1365 = shalt.err (!%p1362_p10)
}
 0x149   : > { %s1452_s2 = smov 128   ;;  %s1453_s26 = smov 8   ;;  %v737_v48 = vsel %vm722_vm3, %v711_v56, 0.0  ;;  %v663_v49 = vpop.permute.xlu0 %662  ;;  %v736_v7 = vsel %vm722_vm3, %v710_v19, 0.0  ;;  %v713_v8 = vmul.f32 %v667_v46, %v1839_v29  ;;  %v756_v23 = vrot.slane %v755_v4, 4  ;;  %v705_v29 = vpop.permute.xlu1 %704 }
 0x14a   : > { %1155 = dma.vmem_to_hbm [thread:$0]  (%p2013_p7), %s1885_s16, 2048, %s1879_s15, %s1715_s21, %s1452_s2, %s1452_s2, %s1453_s26   ;;  %v712_v10 = vmul.f32 %v663_v49, %v1821_v14  ;;  %v738_v11 = vadd.f32 %v737_v48, %v736_v7  ;;  %v718_v25 = vmul.f32 %v1857_v40, %v1828_v21  ;;  %v629_v26 = vadd.f32 1e-06, %v1859_v41 }
 0x14b   : > { %v741_v20 = vsel %vm722_vm3, %v713_v8, 0.0  ;;  %v706_v14 = vmul.f32 %v636_v6, %v1807_v5  ;;  %v707_v31 = vmul.f32 %v1855_v39, %v1814_v9  ;;  %v757_v32 = vadd.f32 %v756_v23, %v755_v4  ;;  %s406_s21 = scalar_lea.vmem [#allocation7], %s1653_s23  ;;  %s1942_s9 = scalar_lea.hbm %s1987_s5, %s1709_s24 }
 0x14c   : > { %v739_v12 = vsel %vm722_vm3, %v712_v10, 0.0  ;;  %v776_v35 = vrot.slane %v629_v26, 1  ;;  %v777_v36 = vrot.slane %v629_v26, 2  ;;  %v721_v13 = vmul.f32 %v705_v29, %v1850_v38  ;;  %s853_s16 = sshll.u32 %s406_s21, 4  ;;  %s825_s22 = scalar_lea.sflag [#allocation4], %s1650_s14  ;;  %s854_s16 = int_to_ptr.vmem [resolvable:$true] %s853_s16 }
 0x14d   : > { %v740_v15 = vadd.f32 %v739_v12, %v738_v11  ;;  %v697_v18 = vpop.permute.xlu0 %696  ;;  %v723_v37 = vsel %vm722_vm3, %v706_v14, 0.0  ;;  %v778_v40 = vrot.slane %v629_v26, 3  ;;  %v724_v9 = vsel %vm722_vm3, %v707_v31, 0.0  ;;  %s1366_s20 = scalar_lea.vmem %s854_s16, 64  ;;  %s1454_s23 = smov [#allocation7]  }
 0x14e   : > { %v719_v24 = vmul.f32 %v697_v18, %v1786_v57  ;;  %v762_v57 = vsel %vm722_vm3, %v718_v25, 0.0  ;;  %v758_v39 = vrot.slane %v757_v32, 2  ;;  %1224 = vrcp.f32 %v776_v35  ;;  %p1367_p2 = scmp.ne.s32.totalorder %s854_s16, %s1366_s20  ;;  %s1370_s13 = sshll.u32 %s1454_s23, 4  ;;  %s1371_s13 = int_to_ptr.vmem [resolvable:$false] %s1370_s13 }
 0x14f   : > { %v742_v22 = vadd.f32 %v741_v20, %v740_v15  ;;  %v725_v43 = vadd.f32 %v724_v9, %v723_v37  ;;  %1226 = vrcp.f32 %v777_v36  ;;  %v767_v38 = vsel %vm722_vm3, %v721_v13, 0.0  ;;  %s1372_s0 = scalar_lea.vmem %s1371_s13, 128  ;;  %p1373_p9 = scmp.lt.s32.totalorder %s854_s16, %s1371_s13 }
 0x150   : > { %v763_v33 = vsel %vm722_vm3, %v719_v24, 0.0  ;;  %1228 = vrcp.f32 %v778_v40  ;;  %v759_v52 = vadd.f32 %v758_v39, %v757_v32  ;;  %vm796_vm4 = vcmask 1041409   ;;  %p1368_p4 = pnand %p1367_p2, %p2013_p7  ;;  %p1374_p0 = scmp.lt.s32.totalorder %s1372_s0, %s1366_s20 }
 0x151   : > { %v743_v27 = vrot.slane %v742_v22, 4  ;;  %v644_v28 = vpop.permute.xlu0 %643  ;;  %v764_v17 = vadd.f32 %v763_v33, %v762_v57  ;;  %1230 = vrcp.f32 %v629_v26  ;;  %vm799_vm5 = vcmask 1042434  }
 0x152   : > { %v708_v34 = vmul.f32 %v644_v28, %v1798_v1  ;;  %v760_v60 = vrot.slane %v759_v52, 1  ;;  %vm802_vm6 = vcmask 1043459   ;;  %p1369_p5 = pneg %p1368_p4  ;;  %p1375_p11 = por %p1374_p0, %p1373_p9 }
 0x153   : > { %v744_v30 = vadd.f32 %v743_v27, %v742_v22 }
 0x154   : > { %v726_v42 = vsel %vm722_vm3, %v708_v34, 0.0  ;;  %v761_v2 = vadd.f32 %v760_v60, %v759_v52  ;;  %p1376_p12 = pnand %p1375_p11, %p1369_p5 }
 0x155   : > { %v701_v21 = vpop.permute.xlu0 %700  ;;  %v745_v41 = vrot.slane %v744_v30, 2  ;;  %v727_v50 = vadd.f32 %v726_v42, %v725_v43 }
 0x156   : > { %v720_v5 = vmul.f32 %v701_v21, %v1863_v45 }
 0x157   : > { %v746_v45 = vadd.f32 %v745_v41, %v744_v30 }
 0x158   : > { %v765_v1 = vsel %vm722_vm3, %v720_v5, 0.0 }
 0x159   : > { %v766_v44 = vadd.f32 %v765_v1, %v764_v17  ;;  %v648_v46 = vpop.permute.xlu0 %647  ;;  %v747_v58 = vrot.slane %v746_v45, 1 }
 0x15a   : > { %v709_v47 = vmul.f32 %v648_v46, %v1883_v3 }
 0x15b   : > { %v768_v51 = vadd.f32 %v767_v38, %v766_v44  ;;  %v748_v63 = vadd.f32 %v747_v58, %v746_v45  ;;  %v1225_v6 = vpop.eup %1224 }
 0x15c   : > { %v728_v53 = vsel %vm722_vm3, %v709_v47, 0.0  ;;  %v1227_v19 = vpop.eup %1226 }
 0x15d   : > { %v769_v54 = vrot.slane %v768_v51, 4  ;;  %v729_v55 = vadd.f32 %v728_v53, %v727_v50  ;;  %v786_v48 = vmul.f32 %v1225_v6, %v748_v63  ;;  %v1229_v8 = vpop.eup %1228  ;;  %v788_v10 = vmul.f32 %v1227_v19, %v761_v2 }
 0x15e   : > { %v1231_v15 = vpop.eup %1230 }
 0x15f   : > { %v770_v16 = vadd.f32 %v769_v54, %v768_v51  ;;  %v730_v59 = vrot.slane %v729_v55, 4  ;;  %v795_v18 = vrot.slane %v786_v48, 7  ;;  %v798_v22 = vrot.slane %v788_v10, 6 }
 0x161   : > { %v771_v61 = vrot.slane %v770_v16, 2  ;;  %v731_v62 = vadd.f32 %v730_v59, %v729_v55 }
 0x163   : > { %v772_v0 = vadd.f32 %v771_v61, %v770_v16  ;;  %v732_v56 = vrot.slane %v731_v62, 2 }
 0x165   : > { %v773_v3 = vrot.slane %v772_v0, 1  ;;  %v733_v4 = vadd.f32 %v732_v56, %v731_v62 }
 0x167   : > { %v774_v49 = vadd.f32 %v773_v3, %v772_v0  ;;  %v734_v7 = vrot.slane %v733_v4, 1 }
 0x169   : > { %v790_v11 = vmul.f32 %v1229_v8, %v774_v49  ;;  %v735_v12 = vadd.f32 %v734_v7, %v733_v4 }
 0x16b   : > { %v784_v20 = vmul.f32 %v1231_v15, %v735_v12  ;;  %v801_v23 = vrot.slane %v790_v11, 5 }
 0x16d   : > { %v797_v24 = vsel %vm796_vm4, %v795_v18, %v784_v20 }
 0x16e   : > { %v800_v25 = vsel %vm799_vm5, %v798_v22, %v797_v24 }
 0x16f   : > { %v803_v26 = vsel %vm802_vm6, %v801_v23, %v800_v25 }
 0x170   : > { %805 = vst.msk [vmem:[%s406_s21] sm:$0xf] %vm625_vm2, %v803_v26 }
 0x171   : > { %1379 = shalt.err (!%p1376_p12)
}
 0x172   : > { %s1380_s24 = scalar_lea.hbm %s1942_s9, 64  ;;  %s1384_s1 = scalar_lea.hbm %s1987_s5, 128 }
 0x173   : > { %p1381_p8 = scmp.ne.s32.totalorder %s1942_s9, %s1380_s24  ;;  %p1385_p3 = scmp.lt.s32.totalorder %s1942_s9, %s1987_s5 }
 0x174   : > { %p1386_p1 = scmp.lt.s32.totalorder %s1384_s1, %s1380_s24 }
 0x175   : > { %p1382_p6 = pnand %p1381_p8, %p2013_p7 }
 0x176   : > { %p1387_p10 = por %p1386_p1, %p1385_p3 }
 0x177   : > { %p1383_p13 = pneg %p1382_p6 }
 0x179   : > { %p1388_p2 = pnand %p1387_p10, %p1383_p13 }
 0x17b   : > { %1391 = shalt.err (!%p1388_p2)
}
 0x17c   : > { %1153 = dma.vmem_to_hbm [thread:$0]  (%p2013_p7), %s854_s16, 64, %s1942_s9, %s825_s22  }
 0x17d PF: > { %s907_s3 = sand.u32 1, %s1430_s27   ;;  %p2015_p4 = scmp.ne.s32.totalorder %s2003_s18, 0 }
 0x17e   : > { %p2016_p5 = scmp.ge.s32.totalorder %s1442_s30, 2  ;;  %s908_s2 = scalar_lea.sflag [#allocation4], %s907_s3 }
 0x180   : > { %p1169_p9 = pnand %p2016_p5, %p2015_p4 }
 0x182   : > { %p1170_p0 = pneg %p1169_p9 }
 0x184   : > { %1417 = dma.done.wait (%p1170_p0), %s908_s2, 64  }
 0x185   : > { %1419 = vsyncadd (%p1170_p0), %s908_s2, 4294967232  ;;  %s2017_s26 = sadd.s32 4294967294, %s1442_s30  }
 0x186   : > { %s916_s21 = sand.u32 1, %s2017_s26  }
 0x187   : > { %s917_s25 = scalar_lea.sflag [#allocation9], %s916_s21 }
 0x188   : > { %1421 = dma.done.wait (%p1170_p0), %s917_s25, 2112  }
 0x189   : > { %1423 = vsyncadd (%p1170_p0), %s917_s25, 4294965184  ;;  %s935_s17 = scalar_lea.sflag [#allocation12], %s907_s3 }
 0x18a   : > { %1425 = dma.done.wait (%p1170_p0), %s935_s17, 64  }
 0x18b   : > { %1427 = vsyncadd (%p1170_p0), %s935_s17, 4294967232  ;;  %s2018_s16 = sld [smem:[#allocation18_spill]]  ;;  %p31_p7 = scmp.ge.s32.totalorder %s1525_s11, 4  }
 0x18c   : > { %s2019_s27 = smov %s1434_s28  ;;  %s2020_s28 = smov %s1438_s29 }
 0x18d   : > { %s2022_s30 = smov %s1525_s11  ;;  %33 = sbr.rel (!%p31_p7) target bundleno = 16 (0x10), region = 156 }
 0x191   : > { %s2021_s29 = smov %s2018_s16 }
 0x192   :  { %940 = vsyncpa [#allocation3], 1 }
 0x193   :  { %942 = vsyncpa [#allocation3 + $0x1], 1 }
 0x194   :  { %943 = vsyncpa [#allocation6], 1 }
 0x195   :  { %945 = vsyncpa [#allocation6 + $0x1], 1 }
 0x196   :  { %946 = vsyncpa [#allocation4], 1 }
 0x197   :  { %948 = vsyncpa [#allocation4 + $0x1], 1 }
 0x198   :  { %949 = vsyncpa [#allocation9], 1 }
 0x199   :  { %951 = vsyncpa [#allocation9 + $0x1], 1 }
 0x19a   :  { %952 = vsyncpa [#allocation12], 1 }
 0x19b   :  { %954 = vsyncpa [#allocation12 + $0x1], 1 }

</bundles_post_ra>
